<compile_context>
chip_gen: v6e
topology: v6e:2x2x1
jax: 0.10.0
libtpu: 0.0.40
codegen_flags: <defaults>
</compile_context>

<pallas_src>
import jax
import jax.numpy as jnp
from jax.experimental import pallas as pl
from jax.experimental.pallas import tpu as pltpu

INPUT_SIZE = 4
HIDDEN_SIZE = 16
OUTPUT_SIZE = 3
BATCH = 2
SEQ = 8


def _build_kernel(T, B, H):
    """Build the BiLSTM kernel for static (T, B, H)."""

    def kernel(
        x_ref,       # (T*B, I)   time-major rows: row t*B + b == x[b, t, :]
        wih_ref,     # (I, 8H)    [fwd gates | bwd gates], gate order (i, f, o, g)
        whh_f_ref,   # (H, 4H)    forward recurrent weights, gate order (i, f, o, g)
        b_f_ref,     # (1, 4H)    b_ih_f + b_hh_f, reordered
        b_b_ref,     # (1, 4H)    b_ih_b + b_hh_b, reordered
        wfc_f_ref,   # (H, O)     fc rows acting on the forward hidden
        wfc_b_ref,   # (H, O)     fc rows acting on the backward hidden
        bfc_ref,     # (1, O)
        out_ref,     # (B, O)
    ):
        # ---- hoisted input projection (both directions, one MXU dot) ----
        gates_x = jnp.dot(
            x_ref[...], wih_ref[...], preferred_element_type=jnp.float32
        )  # (T*B, 8H), lane-dense (8H == 128 for H == 16)

        whh_f = whh_f_ref[...]
        b_f = b_f_ref[...]

        # ---- forward recurrence, unrolled; (h, c) live in registers ----
        h = None
        c = None
        for t in range(T):
            gx = gates_x[t * B:(t + 1) * B, :4 * H]
            if h is None:
                gates = gx + b_f                      # h == 0: skip recurrent dot
            else:
                gates = gx + jnp.dot(
                    h, whh_f, preferred_element_type=jnp.float32
                ) + b_f
            sig = jax.nn.sigmoid(gates[:, :3 * H])    # one EUP launch: i | f | o
            g = jnp.tanh(gates[:, 3 * H:])            # one EUP launch: g
            i = sig[:, :H]
            f = sig[:, H:2 * H]
            o = sig[:, 2 * H:3 * H]
            c = i * g if c is None else f * c + i * g
            h = o * jnp.tanh(c)
        h_fwd = h

        # ---- backward direction: only the t = T-1 step is observed and its
        #      initial state is zero -> no recurrent matmul, no f*c term ----
        gb = gates_x[(T - 1) * B:T * B, 4 * H:] + b_b_ref[...]
        sig_b = jax.nn.sigmoid(gb[:, :3 * H])         # i | f | o (f unused)
        g_b = jnp.tanh(gb[:, 3 * H:])
        i_b = sig_b[:, :H]
        o_b = sig_b[:, 2 * H:3 * H]
        c_b = i_b * g_b
        h_bwd = o_b * jnp.tanh(c_b)

        # ---- fc head, split to avoid a lane concat ----
        out_ref[...] = (
            jnp.dot(h_fwd, wfc_f_ref[...], preferred_element_type=jnp.float32)
            + jnp.dot(h_bwd, wfc_b_ref[...], preferred_element_type=jnp.float32)
            + bfc_ref[...]
        )

    return kernel


def bilstm_predictor(x, kparams):
    """x: (B, T, I) float32 -> (B, O) float32. kparams from prepare_kernel_params."""
    B, T, I = x.shape
    H = kparams["whh_f"].shape[0]
    O = kparams["wfc_f"].shape[1]

    # Time-major, flattened to (T*B, I) so the hoisted input projection is one 2-D dot.
    x2d = jnp.transpose(x, (1, 0, 2)).reshape(T * B, I)

    vmem = pl.BlockSpec(memory_space=pltpu.MemorySpace.VMEM)
    return pl.pallas_call(
        _build_kernel(T, B, H),
        out_shape=jax.ShapeDtypeStruct((B, O), jnp.float32),
        in_specs=[vmem] * 8,
        out_specs=vmem,
    )(
        x2d,
        kparams["wih"], kparams["whh_f"],
        kparams["b_f"], kparams["b_b"],
        kparams["wfc_f"], kparams["wfc_b"], kparams["bfc"],
    )


def init_params(key, input_size, hidden_size, output_size):
    """Deterministic init mirroring PyTorch's U(-1/sqrt(H), 1/sqrt(H)) convention.

    Stored pre-transposed ((in_features, 4H)) in PyTorch gate order (i, f, g, o);
    the kernel-side layout is derived once by prepare_kernel_params().
    """
    ks = jax.random.split(key, 10)
    H, I, O = hidden_size, input_size, output_size
    bound = 1.0 / jnp.sqrt(jnp.float32(H))

    def u(k, shape):
        return jax.random.uniform(k, shape, jnp.float32, -bound, bound)

    return {
        "wih_f": u(ks[0], (I, 4 * H)),
        "whh_f": u(ks[1], (H, 4 * H)),
        "b_f": u(ks[2], (1, 4 * H)) + u(ks[3], (1, 4 * H)),   # b_ih + b_hh combined
        "wih_b": u(ks[4], (I, 4 * H)),
        "whh_b": u(ks[5], (H, 4 * H)),                        # unused by this forward
        "b_b": u(ks[6], (1, 4 * H)) + u(ks[7], (1, 4 * H)),
        "wfc": u(ks[8], (2 * H, O)),
        "bfc": u(ks[9], (1, O)),
    }


def _reorder_gates(w, H):
    """Permute gate columns (i, f, g, o) -> (i, f, o, g). Zero runtime cost (init-time)."""
    return jnp.concatenate(
        [w[..., :2 * H], w[..., 3 * H:4 * H], w[..., 2 * H:3 * H]], axis=-1
    )


def prepare_kernel_params(params):
    """One-time transformation of PyTorch-convention params into the kernel layout."""
    H = params["whh_f"].shape[0]
    wih = jnp.concatenate(
        [_reorder_gates(params["wih_f"], H), _reorder_gates(params["wih_b"], H)],
        axis=1,
    )  # (I, 8H): forward gates | backward gates
    return {
        "wih": wih,
        "whh_f": _reorder_gates(params["whh_f"], H),
        "b_f": _reorder_gates(params["b_f"], H),
        "b_b": _reorder_gates(params["b_b"], H),
        "wfc_f": params["wfc"][:H],
        "wfc_b": params["wfc"][H:],
        "bfc": params["bfc"],
    }


def reference_forward(x, params):
    """Pure-JAX reference of the PyTorch forward pass (eval mode), PyTorch gate order."""
    B, T, I = x.shape
    H = params["whh_f"].shape[0]

    def cell(x_t, h, c, wih, whh, b):
        g = x_t @ wih + h @ whh + b
        i = jax.nn.sigmoid(g[:, :H])
        f = jax.nn.sigmoid(g[:, H:2 * H])
        gg = jnp.tanh(g[:, 2 * H:3 * H])
        o = jax.nn.sigmoid(g[:, 3 * H:])
        c = f * c + i * gg
        h = o * jnp.tanh(c)
        return h, c

    h = jnp.zeros((B, H), jnp.float32)
    c = jnp.zeros((B, H), jnp.float32)
    for t in range(T):
        h, c = cell(x[:, t, :], h, c, params["wih_f"], params["whh_f"], params["b_f"])
    h_fwd = h

    hb = jnp.zeros((B, H), jnp.float32)
    cb = jnp.zeros((B, H), jnp.float32)
    h_bwd, _ = cell(x[:, T - 1, :], hb, cb,
                    params["wih_b"], params["whh_b"], params["b_b"])

    feat = jnp.concatenate([h_fwd, h_bwd], axis=-1)
    return feat @ params["wfc"] + params["bfc"]


if __name__ == "__main__":
    key = jax.random.PRNGKey(0)
    k_x, k_p = jax.random.split(key)

    x = jax.random.normal(k_x, (BATCH, SEQ, INPUT_SIZE), jnp.float32)
    params = init_params(k_p, INPUT_SIZE, HIDDEN_SIZE, OUTPUT_SIZE)
    kparams = prepare_kernel_params(params)

    out = bilstm_predictor(x, kparams)
    out = jax.block_until_ready(out)

    ref = reference_forward(x, params)
    assert out.shape == (BATCH, OUTPUT_SIZE)
    assert jnp.allclose(out, ref, atol=1e-4, rtol=1e-4), (out, ref)

    print("KERNEL_OK")
</pallas_src>

<mosaic_0001>
module attributes {stable_mosaic.version = 11 : i64} {
  func.func @kernel(%arg0: memref<16x4xf32, #tpu.memory_space<vmem>>, %arg1: memref<4x128xf32, #tpu.memory_space<vmem>>, %arg2: memref<16x64xf32, #tpu.memory_space<vmem>>, %arg3: memref<1x64xf32, #tpu.memory_space<vmem>>, %arg4: memref<1x64xf32, #tpu.memory_space<vmem>>, %arg5: memref<16x3xf32, #tpu.memory_space<vmem>>, %arg6: memref<16x3xf32, #tpu.memory_space<vmem>>, %arg7: memref<1x3xf32, #tpu.memory_space<vmem>>, %arg8: memref<2x3xf32, #tpu.memory_space<vmem>>) attributes {dimension_semantics = [], scalar_prefetch = 0 : i64, scratch_operands = 0 : i64, tpu.core_type = #tpu.core_type<tc>} {
    %c0 = arith.constant 0 : index
    %c0_0 = arith.constant 0 : index
    %0 = vector.load %arg0[%c0, %c0_0] : memref<16x4xf32, #tpu.memory_space<vmem>>, vector<16x4xf32>
    %c0_1 = arith.constant 0 : index
    %c0_2 = arith.constant 0 : index
    %1 = vector.load %arg1[%c0_1, %c0_2] : memref<4x128xf32, #tpu.memory_space<vmem>>, vector<4x128xf32>
    %cst = arith.constant dense<0.000000e+00> : vector<16x128xf32>
    %2 = tpu.matmul %0, %1, %cst {dimension_numbers = #tpu.dot_dimension_numbers<[1], [0], [0], [1], [0, 0, 1, 1], [], []>} : vector<16x4xf32>, vector<4x128xf32>, vector<16x128xf32> -> vector<16x128xf32>
    %c0_3 = arith.constant 0 : index
    %c0_4 = arith.constant 0 : index
    %3 = vector.load %arg2[%c0_3, %c0_4] : memref<16x64xf32, #tpu.memory_space<vmem>>, vector<16x64xf32>
    %c0_5 = arith.constant 0 : index
    %c0_6 = arith.constant 0 : index
    %4 = vector.load %arg3[%c0_5, %c0_6] : memref<1x64xf32, #tpu.memory_space<vmem>>, vector<1x64xf32>
    %5 = vector.extract_strided_slice %2 {offsets = [0, 0], sizes = [2, 64], strides = [1, 1]} : vector<16x128xf32> to vector<2x64xf32>
    %6 = vector.broadcast %4 : vector<1x64xf32> to vector<2x64xf32>
    %7 = arith.addf %5, %6 : vector<2x64xf32>
    %8 = vector.extract_strided_slice %7 {offsets = [0, 0], sizes = [2, 48], strides = [1, 1]} : vector<2x64xf32> to vector<2x48xf32>
    %9 = arith.negf %8 : vector<2x48xf32>
    %10 = math.exp %9 : vector<2x48xf32>
    %cst_7 = arith.constant 1.000000e+00 : f32
    %11 = vector.broadcast %cst_7 : f32 to vector<2x48xf32>
    %12 = arith.addf %11, %10 : vector<2x48xf32>
    %13 = arith.divf %11, %12 : vector<2x48xf32>
    %14 = vector.extract_strided_slice %7 {offsets = [0, 48], sizes = [2, 16], strides = [1, 1]} : vector<2x64xf32> to vector<2x16xf32>
    %15 = math.tanh %14 : vector<2x16xf32>
    %16 = vector.extract_strided_slice %13 {offsets = [0, 0], sizes = [2, 16], strides = [1, 1]} : vector<2x48xf32> to vector<2x16xf32>
    %17 = vector.extract_strided_slice %13 {offsets = [0, 32], sizes = [2, 16], strides = [1, 1]} : vector<2x48xf32> to vector<2x16xf32>
    %18 = arith.mulf %16, %15 : vector<2x16xf32>
    %19 = math.tanh %18 : vector<2x16xf32>
    %20 = arith.mulf %17, %19 : vector<2x16xf32>
    %21 = vector.extract_strided_slice %2 {offsets = [2, 0], sizes = [2, 64], strides = [1, 1]} : vector<16x128xf32> to vector<2x64xf32>
    %cst_8 = arith.constant dense<0.000000e+00> : vector<2x64xf32>
    %22 = tpu.matmul %20, %3, %cst_8 {dimension_numbers = #tpu.dot_dimension_numbers<[1], [0], [0], [1], [0, 0, 1, 1], [], []>} : vector<2x16xf32>, vector<16x64xf32>, vector<2x64xf32> -> vector<2x64xf32>
    %23 = arith.addf %21, %22 : vector<2x64xf32>
    %24 = vector.broadcast %4 : vector<1x64xf32> to vector<2x64xf32>
    %25 = arith.addf %23, %24 : vector<2x64xf32>
    %26 = vector.extract_strided_slice %25 {offsets = [0, 0], sizes = [2, 48], strides = [1, 1]} : vector<2x64xf32> to vector<2x48xf32>
    %27 = arith.negf %26 : vector<2x48xf32>
    %28 = math.exp %27 : vector<2x48xf32>
    %cst_9 = arith.constant 1.000000e+00 : f32
    %29 = vector.broadcast %cst_9 : f32 to vector<2x48xf32>
    %30 = arith.addf %29, %28 : vector<2x48xf32>
    %31 = arith.divf %29, %30 : vector<2x48xf32>
    %32 = vector.extract_strided_slice %25 {offsets = [0, 48], sizes = [2, 16], strides = [1, 1]} : vector<2x64xf32> to vector<2x16xf32>
    %33 = math.tanh %32 : vector<2x16xf32>
    %34 = vector.extract_strided_slice %31 {offsets = [0, 0], sizes = [2, 16], strides = [1, 1]} : vector<2x48xf32> to vector<2x16xf32>
    %35 = vector.extract_strided_slice %31 {offsets = [0, 16], sizes = [2, 16], strides = [1, 1]} : vector<2x48xf32> to vector<2x16xf32>
    %36 = vector.extract_strided_slice %31 {offsets = [0, 32], sizes = [2, 16], strides = [1, 1]} : vector<2x48xf32> to vector<2x16xf32>
    %37 = arith.mulf %35, %18 : vector<2x16xf32>
    %38 = arith.mulf %34, %33 : vector<2x16xf32>
    %39 = arith.addf %37, %38 : vector<2x16xf32>
    %40 = math.tanh %39 : vector<2x16xf32>
    %41 = arith.mulf %36, %40 : vector<2x16xf32>
    %42 = vector.extract_strided_slice %2 {offsets = [4, 0], sizes = [2, 64], strides = [1, 1]} : vector<16x128xf32> to vector<2x64xf32>
    %cst_10 = arith.constant dense<0.000000e+00> : vector<2x64xf32>
    %43 = tpu.matmul %41, %3, %cst_10 {dimension_numbers = #tpu.dot_dimension_numbers<[1], [0], [0], [1], [0, 0, 1, 1], [], []>} : vector<2x16xf32>, vector<16x64xf32>, vector<2x64xf32> -> vector<2x64xf32>
    %44 = arith.addf %42, %43 : vector<2x64xf32>
    %45 = vector.broadcast %4 : vector<1x64xf32> to vector<2x64xf32>
    %46 = arith.addf %44, %45 : vector<2x64xf32>
    %47 = vector.extract_strided_slice %46 {offsets = [0, 0], sizes = [2, 48], strides = [1, 1]} : vector<2x64xf32> to vector<2x48xf32>
    %48 = arith.negf %47 : vector<2x48xf32>
    %49 = math.exp %48 : vector<2x48xf32>
    %cst_11 = arith.constant 1.000000e+00 : f32
    %50 = vector.broadcast %cst_11 : f32 to vector<2x48xf32>
    %51 = arith.addf %50, %49 : vector<2x48xf32>
    %52 = arith.divf %50, %51 : vector<2x48xf32>
    %53 = vector.extract_strided_slice %46 {offsets = [0, 48], sizes = [2, 16], strides = [1, 1]} : vector<2x64xf32> to vector<2x16xf32>
    %54 = math.tanh %53 : vector<2x16xf32>
    %55 = vector.extract_strided_slice %52 {offsets = [0, 0], sizes = [2, 16], strides = [1, 1]} : vector<2x48xf32> to vector<2x16xf32>
    %56 = vector.extract_strided_slice %52 {offsets = [0, 16], sizes = [2, 16], strides = [1, 1]} : vector<2x48xf32> to vector<2x16xf32>
    %57 = vector.extract_strided_slice %52 {offsets = [0, 32], sizes = [2, 16], strides = [1, 1]} : vector<2x48xf32> to vector<2x16xf32>
    %58 = arith.mulf %56, %39 : vector<2x16xf32>
    %59 = arith.mulf %55, %54 : vector<2x16xf32>
    %60 = arith.addf %58, %59 : vector<2x16xf32>
    %61 = math.tanh %60 : vector<2x16xf32>
    %62 = arith.mulf %57, %61 : vector<2x16xf32>
    %63 = vector.extract_strided_slice %2 {offsets = [6, 0], sizes = [2, 64], strides = [1, 1]} : vector<16x128xf32> to vector<2x64xf32>
    %cst_12 = arith.constant dense<0.000000e+00> : vector<2x64xf32>
    %64 = tpu.matmul %62, %3, %cst_12 {dimension_numbers = #tpu.dot_dimension_numbers<[1], [0], [0], [1], [0, 0, 1, 1], [], []>} : vector<2x16xf32>, vector<16x64xf32>, vector<2x64xf32> -> vector<2x64xf32>
    %65 = arith.addf %63, %64 : vector<2x64xf32>
    %66 = vector.broadcast %4 : vector<1x64xf32> to vector<2x64xf32>
    %67 = arith.addf %65, %66 : vector<2x64xf32>
    %68 = vector.extract_strided_slice %67 {offsets = [0, 0], sizes = [2, 48], strides = [1, 1]} : vector<2x64xf32> to vector<2x48xf32>
    %69 = arith.negf %68 : vector<2x48xf32>
    %70 = math.exp %69 : vector<2x48xf32>
    %cst_13 = arith.constant 1.000000e+00 : f32
    %71 = vector.broadcast %cst_13 : f32 to vector<2x48xf32>
    %72 = arith.addf %71, %70 : vector<2x48xf32>
    %73 = arith.divf %71, %72 : vector<2x48xf32>
    %74 = vector.extract_strided_slice %67 {offsets = [0, 48], sizes = [2, 16], strides = [1, 1]} : vector<2x64xf32> to vector<2x16xf32>
    %75 = math.tanh %74 : vector<2x16xf32>
    %76 = vector.extract_strided_slice %73 {offsets = [0, 0], sizes = [2, 16], strides = [1, 1]} : vector<2x48xf32> to vector<2x16xf32>
    %77 = vector.extract_strided_slice %73 {offsets = [0, 16], sizes = [2, 16], strides = [1, 1]} : vector<2x48xf32> to vector<2x16xf32>
    %78 = vector.extract_strided_slice %73 {offsets = [0, 32], sizes = [2, 16], strides = [1, 1]} : vector<2x48xf32> to vector<2x16xf32>
    %79 = arith.mulf %77, %60 : vector<2x16xf32>
    %80 = arith.mulf %76, %75 : vector<2x16xf32>
    %81 = arith.addf %79, %80 : vector<2x16xf32>
    %82 = math.tanh %81 : vector<2x16xf32>
    %83 = arith.mulf %78, %82 : vector<2x16xf32>
    %84 = vector.extract_strided_slice %2 {offsets = [8, 0], sizes = [2, 64], strides = [1, 1]} : vector<16x128xf32> to vector<2x64xf32>
    %cst_14 = arith.constant dense<0.000000e+00> : vector<2x64xf32>
    %85 = tpu.matmul %83, %3, %cst_14 {dimension_numbers = #tpu.dot_dimension_numbers<[1], [0], [0], [1], [0, 0, 1, 1], [], []>} : vector<2x16xf32>, vector<16x64xf32>, vector<2x64xf32> -> vector<2x64xf32>
    %86 = arith.addf %84, %85 : vector<2x64xf32>
    %87 = vector.broadcast %4 : vector<1x64xf32> to vector<2x64xf32>
    %88 = arith.addf %86, %87 : vector<2x64xf32>
    %89 = vector.extract_strided_slice %88 {offsets = [0, 0], sizes = [2, 48], strides = [1, 1]} : vector<2x64xf32> to vector<2x48xf32>
    %90 = arith.negf %89 : vector<2x48xf32>
    %91 = math.exp %90 : vector<2x48xf32>
    %cst_15 = arith.constant 1.000000e+00 : f32
    %92 = vector.broadcast %cst_15 : f32 to vector<2x48xf32>
    %93 = arith.addf %92, %91 : vector<2x48xf32>
    %94 = arith.divf %92, %93 : vector<2x48xf32>
    %95 = vector.extract_strided_slice %88 {offsets = [0, 48], sizes = [2, 16], strides = [1, 1]} : vector<2x64xf32> to vector<2x16xf32>
    %96 = math.tanh %95 : vector<2x16xf32>
    %97 = vector.extract_strided_slice %94 {offsets = [0, 0], sizes = [2, 16], strides = [1, 1]} : vector<2x48xf32> to vector<2x16xf32>
    %98 = vector.extract_strided_slice %94 {offsets = [0, 16], sizes = [2, 16], strides = [1, 1]} : vector<2x48xf32> to vector<2x16xf32>
    %99 = vector.extract_strided_slice %94 {offsets = [0, 32], sizes = [2, 16], strides = [1, 1]} : vector<2x48xf32> to vector<2x16xf32>
    %100 = arith.mulf %98, %81 : vector<2x16xf32>
    %101 = arith.mulf %97, %96 : vector<2x16xf32>
    %102 = arith.addf %100, %101 : vector<2x16xf32>
    %103 = math.tanh %102 : vector<2x16xf32>
    %104 = arith.mulf %99, %103 : vector<2x16xf32>
    %105 = vector.extract_strided_slice %2 {offsets = [10, 0], sizes = [2, 64], strides = [1, 1]} : vector<16x128xf32> to vector<2x64xf32>
    %cst_16 = arith.constant dense<0.000000e+00> : vector<2x64xf32>
    %106 = tpu.matmul %104, %3, %cst_16 {dimension_numbers = #tpu.dot_dimension_numbers<[1], [0], [0], [1], [0, 0, 1, 1], [], []>} : vector<2x16xf32>, vector<16x64xf32>, vector<2x64xf32> -> vector<2x64xf32>
    %107 = arith.addf %105, %106 : vector<2x64xf32>
    %108 = vector.broadcast %4 : vector<1x64xf32> to vector<2x64xf32>
    %109 = arith.addf %107, %108 : vector<2x64xf32>
    %110 = vector.extract_strided_slice %109 {offsets = [0, 0], sizes = [2, 48], strides = [1, 1]} : vector<2x64xf32> to vector<2x48xf32>
    %111 = arith.negf %110 : vector<2x48xf32>
    %112 = math.exp %111 : vector<2x48xf32>
    %cst_17 = arith.constant 1.000000e+00 : f32
    %113 = vector.broadcast %cst_17 : f32 to vector<2x48xf32>
    %114 = arith.addf %113, %112 : vector<2x48xf32>
    %115 = arith.divf %113, %114 : vector<2x48xf32>
    %116 = vector.extract_strided_slice %109 {offsets = [0, 48], sizes = [2, 16], strides = [1, 1]} : vector<2x64xf32> to vector<2x16xf32>
    %117 = math.tanh %116 : vector<2x16xf32>
    %118 = vector.extract_strided_slice %115 {offsets = [0, 0], sizes = [2, 16], strides = [1, 1]} : vector<2x48xf32> to vector<2x16xf32>
    %119 = vector.extract_strided_slice %115 {offsets = [0, 16], sizes = [2, 16], strides = [1, 1]} : vector<2x48xf32> to vector<2x16xf32>
    %120 = vector.extract_strided_slice %115 {offsets = [0, 32], sizes = [2, 16], strides = [1, 1]} : vector<2x48xf32> to vector<2x16xf32>
    %121 = arith.mulf %119, %102 : vector<2x16xf32>
    %122 = arith.mulf %118, %117 : vector<2x16xf32>
    %123 = arith.addf %121, %122 : vector<2x16xf32>
    %124 = math.tanh %123 : vector<2x16xf32>
    %125 = arith.mulf %120, %124 : vector<2x16xf32>
    %126 = vector.extract_strided_slice %2 {offsets = [12, 0], sizes = [2, 64], strides = [1, 1]} : vector<16x128xf32> to vector<2x64xf32>
    %cst_18 = arith.constant dense<0.000000e+00> : vector<2x64xf32>
    %127 = tpu.matmul %125, %3, %cst_18 {dimension_numbers = #tpu.dot_dimension_numbers<[1], [0], [0], [1], [0, 0, 1, 1], [], []>} : vector<2x16xf32>, vector<16x64xf32>, vector<2x64xf32> -> vector<2x64xf32>
    %128 = arith.addf %126, %127 : vector<2x64xf32>
    %129 = vector.broadcast %4 : vector<1x64xf32> to vector<2x64xf32>
    %130 = arith.addf %128, %129 : vector<2x64xf32>
    %131 = vector.extract_strided_slice %130 {offsets = [0, 0], sizes = [2, 48], strides = [1, 1]} : vector<2x64xf32> to vector<2x48xf32>
    %132 = arith.negf %131 : vector<2x48xf32>
    %133 = math.exp %132 : vector<2x48xf32>
    %cst_19 = arith.constant 1.000000e+00 : f32
    %134 = vector.broadcast %cst_19 : f32 to vector<2x48xf32>
    %135 = arith.addf %134, %133 : vector<2x48xf32>
    %136 = arith.divf %134, %135 : vector<2x48xf32>
    %137 = vector.extract_strided_slice %130 {offsets = [0, 48], sizes = [2, 16], strides = [1, 1]} : vector<2x64xf32> to vector<2x16xf32>
    %138 = math.tanh %137 : vector<2x16xf32>
    %139 = vector.extract_strided_slice %136 {offsets = [0, 0], sizes = [2, 16], strides = [1, 1]} : vector<2x48xf32> to vector<2x16xf32>
    %140 = vector.extract_strided_slice %136 {offsets = [0, 16], sizes = [2, 16], strides = [1, 1]} : vector<2x48xf32> to vector<2x16xf32>
    %141 = vector.extract_strided_slice %136 {offsets = [0, 32], sizes = [2, 16], strides = [1, 1]} : vector<2x48xf32> to vector<2x16xf32>
    %142 = arith.mulf %140, %123 : vector<2x16xf32>
    %143 = arith.mulf %139, %138 : vector<2x16xf32>
    %144 = arith.addf %142, %143 : vector<2x16xf32>
    %145 = math.tanh %144 : vector<2x16xf32>
    %146 = arith.mulf %141, %145 : vector<2x16xf32>
    %147 = vector.extract_strided_slice %2 {offsets = [14, 0], sizes = [2, 64], strides = [1, 1]} : vector<16x128xf32> to vector<2x64xf32>
    %cst_20 = arith.constant dense<0.000000e+00> : vector<2x64xf32>
    %148 = tpu.matmul %146, %3, %cst_20 {dimension_numbers = #tpu.dot_dimension_numbers<[1], [0], [0], [1], [0, 0, 1, 1], [], []>} : vector<2x16xf32>, vector<16x64xf32>, vector<2x64xf32> -> vector<2x64xf32>
    %149 = arith.addf %147, %148 : vector<2x64xf32>
    %150 = vector.broadcast %4 : vector<1x64xf32> to vector<2x64xf32>
    %151 = arith.addf %149, %150 : vector<2x64xf32>
    %152 = vector.extract_strided_slice %151 {offsets = [0, 0], sizes = [2, 48], strides = [1, 1]} : vector<2x64xf32> to vector<2x48xf32>
    %153 = arith.negf %152 : vector<2x48xf32>
    %154 = math.exp %153 : vector<2x48xf32>
    %cst_21 = arith.constant 1.000000e+00 : f32
    %155 = vector.broadcast %cst_21 : f32 to vector<2x48xf32>
    %156 = arith.addf %155, %154 : vector<2x48xf32>
    %157 = arith.divf %155, %156 : vector<2x48xf32>
    %158 = vector.extract_strided_slice %151 {offsets = [0, 48], sizes = [2, 16], strides = [1, 1]} : vector<2x64xf32> to vector<2x16xf32>
    %159 = math.tanh %158 : vector<2x16xf32>
    %160 = vector.extract_strided_slice %157 {offsets = [0, 0], sizes = [2, 16], strides = [1, 1]} : vector<2x48xf32> to vector<2x16xf32>
    %161 = vector.extract_strided_slice %157 {offsets = [0, 16], sizes = [2, 16], strides = [1, 1]} : vector<2x48xf32> to vector<2x16xf32>
    %162 = vector.extract_strided_slice %157 {offsets = [0, 32], sizes = [2, 16], strides = [1, 1]} : vector<2x48xf32> to vector<2x16xf32>
    %163 = arith.mulf %161, %144 : vector<2x16xf32>
    %164 = arith.mulf %160, %159 : vector<2x16xf32>
    %165 = arith.addf %163, %164 : vector<2x16xf32>
    %166 = math.tanh %165 : vector<2x16xf32>
    %167 = arith.mulf %162, %166 : vector<2x16xf32>
    %168 = vector.extract_strided_slice %2 {offsets = [14, 64], sizes = [2, 64], strides = [1, 1]} : vector<16x128xf32> to vector<2x64xf32>
    %c0_22 = arith.constant 0 : index
    %c0_23 = arith.constant 0 : index
    %169 = vector.load %arg4[%c0_22, %c0_23] : memref<1x64xf32, #tpu.memory_space<vmem>>, vector<1x64xf32>
    %170 = vector.broadcast %169 : vector<1x64xf32> to vector<2x64xf32>
    %171 = arith.addf %168, %170 : vector<2x64xf32>
    %172 = vector.extract_strided_slice %171 {offsets = [0, 0], sizes = [2, 48], strides = [1, 1]} : vector<2x64xf32> to vector<2x48xf32>
    %173 = arith.negf %172 : vector<2x48xf32>
    %174 = math.exp %173 : vector<2x48xf32>
    %cst_24 = arith.constant 1.000000e+00 : f32
    %175 = vector.broadcast %cst_24 : f32 to vector<2x48xf32>
    %176 = arith.addf %175, %174 : vector<2x48xf32>
    %177 = arith.divf %175, %176 : vector<2x48xf32>
    %178 = vector.extract_strided_slice %171 {offsets = [0, 48], sizes = [2, 16], strides = [1, 1]} : vector<2x64xf32> to vector<2x16xf32>
    %179 = math.tanh %178 : vector<2x16xf32>
    %180 = vector.extract_strided_slice %177 {offsets = [0, 0], sizes = [2, 16], strides = [1, 1]} : vector<2x48xf32> to vector<2x16xf32>
    %181 = vector.extract_strided_slice %177 {offsets = [0, 32], sizes = [2, 16], strides = [1, 1]} : vector<2x48xf32> to vector<2x16xf32>
    %182 = arith.mulf %180, %179 : vector<2x16xf32>
    %183 = math.tanh %182 : vector<2x16xf32>
    %184 = arith.mulf %181, %183 : vector<2x16xf32>
    %c0_25 = arith.constant 0 : index
    %c0_26 = arith.constant 0 : index
    %185 = vector.load %arg5[%c0_25, %c0_26] : memref<16x3xf32, #tpu.memory_space<vmem>>, vector<16x3xf32>
    %cst_27 = arith.constant dense<0.000000e+00> : vector<2x3xf32>
    %186 = tpu.matmul %167, %185, %cst_27 {dimension_numbers = #tpu.dot_dimension_numbers<[1], [0], [0], [1], [0, 0, 1, 1], [], []>} : vector<2x16xf32>, vector<16x3xf32>, vector<2x3xf32> -> vector<2x3xf32>
    %c0_28 = arith.constant 0 : index
    %c0_29 = arith.constant 0 : index
    %187 = vector.load %arg6[%c0_28, %c0_29] : memref<16x3xf32, #tpu.memory_space<vmem>>, vector<16x3xf32>
    %cst_30 = arith.constant dense<0.000000e+00> : vector<2x3xf32>
    %188 = tpu.matmul %184, %187, %cst_30 {dimension_numbers = #tpu.dot_dimension_numbers<[1], [0], [0], [1], [0, 0, 1, 1], [], []>} : vector<2x16xf32>, vector<16x3xf32>, vector<2x3xf32> -> vector<2x3xf32>
    %189 = arith.addf %186, %188 : vector<2x3xf32>
    %c0_31 = arith.constant 0 : index
    %c0_32 = arith.constant 0 : index
    %190 = vector.load %arg7[%c0_31, %c0_32] : memref<1x3xf32, #tpu.memory_space<vmem>>, vector<1x3xf32>
    %191 = vector.broadcast %190 : vector<1x3xf32> to vector<2x3xf32>
    %192 = arith.addf %189, %191 : vector<2x3xf32>
    %c0_33 = arith.constant 0 : index
    %c0_34 = arith.constant 0 : index
    %193 = vector.load %arg8[%c0_33, %c0_34] : memref<2x3xf32, #tpu.memory_space<vmem>>, vector<2x3xf32>
    tpu.vector_store %arg8[%c0_33, %c0_34], %192 {strides = array<i32>} : memref<2x3xf32, #tpu.memory_space<vmem>>, vector<2x3xf32>,
    return
  }
}

</mosaic_0001>

<bundles_post_ra>
// kernel: tpu_custom_call.1
= control target key start
LH: loop header
LB: loop body
LE: loop exit
PB: predicated region body
PF: predicated region fallthrough
CT: control target
= control target key end

     0   :  { %vm40_vm0 = vcmask 1043456   ;;  %vm33_vm1 = vcmask 31744   ;;  %s1546_s0 = inlined_call_operand.vmem [shape: f32[16,4], index: 0, kind: input, shape index: {}]   ;;  %s1547_s1 = inlined_call_operand.vmem [shape: f32[4,128], index: 1, kind: input, shape index: {}]   ;;  %s1548_s2 = inlined_call_operand.vmem [shape: f32[16,64], index: 2, kind: input, shape index: {}]   ;;  %s1549_s3 = inlined_call_operand.vmem [shape: f32[1,64], index: 3, kind: input, shape index: {}]   ;;  %s1550_s4 = inlined_call_operand.vmem [shape: f32[1,64], index: 4, kind: input, shape index: {}]   ;;  %s1551_s5 = inlined_call_operand.vmem [shape: f32[16,3], index: 5, kind: input, shape index: {}]   ;;  %s1552_s6 = inlined_call_operand.vmem [shape: f32[16,3], index: 6, kind: input, shape index: {}]   ;;  %s1553_s7 = inlined_call_operand.vmem [shape: f32[1,3], index: 7, kind: input, shape index: {}]   ;;  %s1554_s8 = inlined_call_operand.hbm [shape: f32[2,3], index: 8, kind: output, shape index: {}]  }
   0x1   :  { %v32_v0 = vld [vmem:[%s1547_s1] sm:$0xf]  ;;  %v31_v2 = vld [vmem:[%s1546_s0 + $0x8] sm:$0xff] }
   0x2   :  { %v30_v1 = vld [vmem:[%s1546_s0] sm:$0xff]  ;;  %1163 = vmatprep.subr.msk.mxu0 %vm40_vm0, %v32_v0 }
   0x3   :  { %1165 = vmatprep.mubr.msk.f32.mxu0 %vm33_vm1, %v30_v1 }
   0x4   :  { %13 = vsyncpa [#allocation3], 0  ;;  %1164 = vmatpush3.msk.msra.mxu0 %vm40_vm0, %v32_v0  ;;  %v1400_v4 = vld [vmem:[%s1549_s3] ss:$0 sm:$0xff]  ;;  %s1333_s0 = smov 80   ;;  %v1410_v14 = vld [vmem:[%s1548_s2 + $0x8] sm:$0xff] }
   0x5   :  { %1166 = vmatmul.mubr.msk.f32.vlgmr.msra.gmra.mxu0 %vm33_vm1, %v31_v2  ;;  %v1334_v15 = vmov 0.0   ;;  %v1416_v16 = vld [vmem:[%s1548_s2] sm:$0xff]  ;;  %vm1335_vm2 = vmmov 0   ;;  %s1336_s2 = smov 32   ;;  %s1337_s15 = smov 16   ;;  %vm150_vm3 = vcmask 130048  }
   0x6   :  { %1168 = vmatprep.subr.mxu1 %v1334_v15  ;;  %1172 = vmatprep.mubr.msk.f32.mxu1 %vm1335_vm2, %v1334_v15  ;;  %s1338_s16 = smov 96   ;;  %s1339_s19 = smov 64   ;;  %vm1093_vm4 = vcmask 17408  }
   0x7   :  { %1169 = vmatpush3.msra.mxu1 %v1410_v14  ;;  %1175 = vmatprep.subr.mxu0 %v1334_v15  ;;  %s1340_s27 = smov [#allocation2]  }
   0x8   :  { %1170 = vmatprep.subr.mxu1 %v1334_v15  ;;  %1176 = vmatpush3.msra.mxu0 %v1410_v14  ;;  %s1101_s28 = sshll.u32 %s1340_s27, 4  ;;  %s1102_s28 = int_to_ptr.vmem [resolvable:$true] %s1101_s28 }
   0x9   :  { %1171 = vmatpush3.msra.mxu1 %v1416_v16  ;;  %1177 = vmatprep.subr.mxu0 %v1334_v15  ;;  %s1311_s29 = scalar_lea.vmem %s1102_s28, 32  ;;  %p1316_p1 = scmp.lt.s32.totalorder %s1102_s28, %s1102_s28 }
   0xa   :  { %1178 = vmatpush3.msra.mxu0 %v1416_v16  ;;  %1179 = vmatprep.mubr.msk.f32.mxu0 %vm1335_vm2, %v1334_v15  ;;  %p1312_p0 = scmp.ne.s32.totalorder %s1102_s28, %s1311_s29  ;;  %p1317_p2 = scmp.lt.s32.totalorder %s1311_s29, %s1311_s29 }
   0xb   :  { %1182 = vmatprep.subr.mxu1 %v1334_v15  ;;  %1189 = vmatprep.subr.mxu0 %v1334_v15 }
   0xc   :  { %p1318_p3 = por %p1317_p2, %p1316_p1 }
   0xe   :  { %p1319_p4 = pnand %p1318_p3, %p1312_p0 }
  0xc5   :  { %v1395_v3 = vpop.f32.mrf.mxu0 }
  0xc7   :  { %v1402_v5 = vpop.f32.mrf.mxu0 }
  0xc8   :  { %v128_v6 = vadd.f32 %v1400_v4, %v1402_v5 }
  0xca   :  { %1239 = vtanh.f32 %v128_v6  ;;  %v1113_v8 = vmul.f32 -1.442695, %v128_v6 }
  0xcc   :  { %1241 = vpow2.f32 %v1113_v8 }
  0xd7   :  { %v1240_v7 = vpop.eup %1239 }
  0xd8   :  { %137 = vrot.lane.b32.xlu0 %v1240_v7, %s1333_s0 }
  0xd9   :  { %v1242_v9 = vpop.eup %1241 }
  0xda   :  { %v132_v10 = vadd.f32 1.0, %v1242_v9 }
  0xdc   :  { %1243 = vrcp.f32 %v132_v10 }
  0xe9   :  { %v1244_v11 = vpop.eup %1243 }
 0x14a   :  { %v138_v12 = vpop.permute.xlu0 %137 }
 0x14b   :  { %v140_v13 = vmul.f32 %v1244_v11, %v138_v12 }
 0x14d   :  { %1245 = vtanh.f32 %v140_v13  ;;  %v236_v18 = vrot.slane %v140_v13, 6 }
 0x15a   :  { %v1246_v17 = vpop.eup %1245 }
 0x15b   :  { %143 = vrot.lane.b32.xlu0 %v1246_v17, %s1336_s2 }
 0x15f   :  { %237 = vrot.lane.b32.xlu0 %v236_v18, %s1337_s15 }
 0x1cd   :  { %v144_v19 = vpop.permute.xlu0 %143 }
 0x1ce   :  { %v146_v20 = vmul.f32 %v1244_v11, %v144_v19 }
 0x1d0   :  { %148 = vrot.lane.b32.xlu1 %v146_v20, %s1338_s16 }
 0x1d1   :  { %v238_v34 = vpop.permute.xlu0 %237 }
 0x242   :  { %v149_v21 = vpop.permute.xlu1 %148 }
 0x243   :  { %1173 = vmatmul.mubr.msk.f32.vlgmr.msra.gmra.mxu1 %vm150_vm3, %v149_v21 }
 0x244   :  { %1183 = vmatpush3.msra.mxu1 %v1410_v14  ;;  %1186 = vmatprep.mubr.msk.f32.mxu1 %vm1335_vm2, %v1334_v15 }
 0x245   :  { %1184 = vmatprep.subr.mxu1 %v1334_v15 }
 0x246   :  { %1185 = vmatpush3.msra.mxu1 %v1416_v16 }
 0x247   :  { %1196 = vmatprep.subr.mxu1 %v1334_v15 }
 0x303   :  { %v219_v22 = vpop.f32.mrf.mxu1 }
 0x304   :  { %v224_v23 = vrot.slane %v219_v22, 6 }
 0x305   :  { %v1174_v24 = vpop.f32.mrf.mxu1 }
 0x306   :  { %v226_v25 = vadd.f32 %v224_v23, %v1402_v5 }
 0x308   :  { %v227_v26 = vadd.f32 %v1400_v4, %v226_v25 }
 0x30a   :  { %1247 = vtanh.f32 %v227_v26  ;;  %v1115_v28 = vmul.f32 -1.442695, %v227_v26 }
 0x30c   :  { %1249 = vpow2.f32 %v1115_v28 }
 0x317   :  { %v1248_v27 = vpop.eup %1247 }
 0x318   :  { %242 = vrot.lane.b32.xlu1 %v1248_v27, %s1333_s0 }
 0x319   :  { %v1250_v29 = vpop.eup %1249 }
 0x31a   :  { %v231_v30 = vadd.f32 1.0, %v1250_v29 }
 0x31c   :  { %1251 = vrcp.f32 %v231_v30 }
 0x329   :  { %v1252_v31 = vpop.eup %1251 }
 0x32a   :  { %v240_v35 = vmul.f32 %v1252_v31, %v238_v34 }
 0x38a   :  { %v243_v32 = vpop.permute.xlu1 %242 }
 0x38b   :  { %v245_v33 = vmul.f32 %v1252_v31, %v243_v32 }
 0x38d   :  { %247 = vrot.lane.b32.xlu1 %v245_v33, %s1337_s15 }
 0x3ff   :  { %v248_v36 = vpop.permute.xlu1 %247 }
 0x400   :  { %v250_v37 = vadd.f32 %v248_v36, %v240_v35 }
 0x402   :  { %1253 = vtanh.f32 %v250_v37  ;;  %v346_v55 = vrot.slane %v250_v37, 6 }
 0x40f   :  { %v1254_v38 = vpop.eup %1253 }
 0x410   :  { %253 = vrot.lane.b32.xlu0 %v1254_v38, %s1337_s15 }
 0x482   :  { %v254_v39 = vpop.permute.xlu0 %253 }
 0x483   :  { %v256_v40 = vmul.f32 %v1252_v31, %v254_v39 }
 0x485   :  { %v258_v41 = vrot.slane %v256_v40, 2 }
 0x487   :  { %259 = vrot.lane.b32.xlu1 %v258_v41, %s1338_s16 }
 0x4f9   :  { %v260_v42 = vpop.permute.xlu1 %259 }
 0x4fa   :  { %1180 = vmatmul.mubr.msk.f32.vlgmr.msra.gmra.mxu0 %vm150_vm3, %v260_v42 }
 0x4fb   :  { %1190 = vmatpush3.msra.mxu0 %v1410_v14  ;;  %1193 = vmatprep.mubr.msk.f32.mxu0 %vm1335_vm2, %v1334_v15 }
 0x4fc   :  { %1191 = vmatprep.subr.mxu0 %v1334_v15 }
 0x4fd   :  { %1192 = vmatpush3.msra.mxu0 %v1416_v16 }
 0x4fe   :  { %1203 = vmatprep.subr.mxu0 %v1334_v15 }
 0x5ba   :  { %v329_v43 = vpop.f32.mrf.mxu0 }
 0x5bb   :  { %v334_v44 = vrot.slane %v329_v43, 4 }
 0x5bc   :  { %v1181_v45 = vpop.f32.mrf.mxu0 }
 0x5bd   :  { %v336_v46 = vadd.f32 %v334_v44, %v1402_v5 }
 0x5bf   :  { %v337_v47 = vadd.f32 %v1400_v4, %v336_v46 }
 0x5c1   :  { %1255 = vtanh.f32 %v337_v47  ;;  %v1117_v49 = vmul.f32 -1.442695, %v337_v47 }
 0x5c3   :  { %1257 = vpow2.f32 %v1117_v49 }
 0x5ce   :  { %v1256_v48 = vpop.eup %1255 }
 0x5cf   :  { %350 = vrot.lane.b32.xlu0 %v1256_v48, %s1333_s0 }
 0x5d0   :  { %v1258_v50 = vpop.eup %1257 }
 0x5d1   :  { %v341_v51 = vadd.f32 1.0, %v1258_v50 }
 0x5d3   :  { %1259 = vrcp.f32 %v341_v51 }
 0x5e0   :  { %v1260_v52 = vpop.eup %1259 }
 0x5e1   :  { %v348_v56 = vmul.f32 %v1260_v52, %v346_v55 }
 0x641   :  { %v351_v53 = vpop.permute.xlu0 %350 }
 0x642   :  { %v353_v54 = vmul.f32 %v1260_v52, %v351_v53 }
 0x644   :  { %355 = vrot.lane.b32.xlu1 %v353_v54, %s1337_s15 }
 0x6b6   :  { %v356_v57 = vpop.permute.xlu1 %355 }
 0x6b7   :  { %v358_v58 = vadd.f32 %v356_v57, %v348_v56 }
 0x6b9   :  { %1261 = vtanh.f32 %v358_v58  ;;  %v454_v18 = vrot.slane %v358_v58, 6 }
 0x6c6   :  { %v1262_v59 = vpop.eup %1261 }
 0x6c7   :  { %361 = vrot.lane.b32.xlu0 %v1262_v59, %s1337_s15 }
 0x739   :  { %v362_v60 = vpop.permute.xlu0 %361 }
 0x73a   :  { %v364_v61 = vmul.f32 %v1260_v52, %v362_v60 }
 0x73c   :  { %v366_v62 = vrot.slane %v364_v61, 4 }
 0x73e   :  { %367 = vrot.lane.b32.xlu1 %v366_v62, %s1338_s16 }
 0x7b0   :  { %v368_v63 = vpop.permute.xlu1 %367 }
 0x7b1   :  { %1187 = vmatmul.mubr.msk.f32.vlgmr.msra.gmra.mxu1 %vm150_vm3, %v368_v63 }
 0x7b2   :  { %1197 = vmatpush3.msra.mxu1 %v1410_v14  ;;  %1200 = vmatprep.mubr.msk.f32.mxu1 %vm1335_vm2, %v1334_v15 }
 0x7b3   :  { %1198 = vmatprep.subr.mxu1 %v1334_v15 }
 0x7b4   :  { %1199 = vmatpush3.msra.mxu1 %v1416_v16 }
 0x7b5   :  { %1210 = vmatprep.subr.mxu1 %v1334_v15 }
 0x871   :  { %v437_v0 = vpop.f32.mrf.mxu1 }
 0x872   :  { %v442_v1 = vrot.slane %v437_v0, 2 }
 0x873   :  { %v1188_v2 = vpop.f32.mrf.mxu1 }
 0x874   :  { %v444_v6 = vadd.f32 %v442_v1, %v1402_v5 }
 0x876   :  { %v445_v7 = vadd.f32 %v1400_v4, %v444_v6 }
 0x878   :  { %1263 = vtanh.f32 %v445_v7  ;;  %v1119_v9 = vmul.f32 -1.442695, %v445_v7 }
 0x87a   :  { %1265 = vpow2.f32 %v1119_v9 }
 0x885   :  { %v1264_v8 = vpop.eup %1263 }
 0x886   :  { %458 = vrot.lane.b32.xlu0 %v1264_v8, %s1333_s0 }
 0x887   :  { %v1266_v10 = vpop.eup %1265 }
 0x888   :  { %v449_v11 = vadd.f32 1.0, %v1266_v10 }
 0x88a   :  { %1267 = vrcp.f32 %v449_v11 }
 0x897   :  { %v1268_v12 = vpop.eup %1267 }
 0x898   :  { %v456_v19 = vmul.f32 %v1268_v12, %v454_v18 }
 0x8f8   :  { %v459_v13 = vpop.permute.xlu0 %458 }
 0x8f9   :  { %v461_v17 = vmul.f32 %v1268_v12, %v459_v13 }
 0x8fb   :  { %463 = vrot.lane.b32.xlu1 %v461_v17, %s1337_s15 }
 0x96d   :  { %v464_v20 = vpop.permute.xlu1 %463 }
 0x96e   :  { %v466_v5 = vadd.f32 %v464_v20, %v456_v19 }
 0x970   :  { %1269 = vtanh.f32 %v466_v5  ;;  %v559_v37 = vrot.slane %v466_v5, 6 }
 0x97d   :  { %v1270_v21 = vpop.eup %1269 }
 0x97e   :  { %469 = vrot.lane.b32.xlu0 %v1270_v21, %s1337_s15 }
 0x9f0   :  { %v470_v22 = vpop.permute.xlu0 %469 }
 0x9f1   :  { %v472_v23 = vmul.f32 %v1268_v12, %v470_v22  ;;  %v1128_v22 = vld [vmem:[%s1550_s4] ss:$0 sm:$0xff] }
 0x9f3   :  { %v474_v24 = vrot.slane %v472_v23, 6 }
 0x9f5   :  { %475 = vrot.lane.b32.xlu1 %v474_v24, %s1338_s16 }
 0xa67   :  { %v476_v25 = vpop.permute.xlu1 %475 }
 0xa68   :  { %1194 = vmatmul.mubr.msk.f32.vlgmr.msra.gmra.mxu0 %vm150_vm3, %v476_v25 }
 0xa69   :  { %1204 = vmatpush3.msra.mxu0 %v1410_v14  ;;  %1207 = vmatprep.mubr.msk.f32.mxu0 %vm1335_vm2, %v1334_v15 }
 0xa6a   :  { %1205 = vmatprep.subr.mxu0 %v1334_v15 }
 0xa6b   :  { %1206 = vmatpush3.msra.mxu0 %v1416_v16 }
 0xa6c   :  { %1217 = vmatprep.subr.mxu0 %v1334_v15 }
 0xb28   :  { %v545_v26 = vpop.f32.mrf.mxu0 }
 0xb29   :  { %v549_v27 = vadd.f32 %v1395_v3, %v545_v26 }
 0xb2a   :  { %v1195_v28 = vpop.f32.mrf.mxu0 }
 0xb2b   :  { %v550_v29 = vadd.f32 %v1400_v4, %v549_v27 }
 0xb2d   :  { %1271 = vtanh.f32 %v550_v29  ;;  %v1121_v31 = vmul.f32 -1.442695, %v550_v29 }
 0xb2f   :  { %1273 = vpow2.f32 %v1121_v31 }
 0xb3a   :  { %v1272_v30 = vpop.eup %1271 }
 0xb3b   :  { %563 = vrot.lane.b32.xlu0 %v1272_v30, %s1333_s0 }
 0xb3c   :  { %v1274_v32 = vpop.eup %1273 }
 0xb3d   :  { %v554_v33 = vadd.f32 1.0, %v1274_v32 }
 0xb3f   :  { %1275 = vrcp.f32 %v554_v33 }
 0xb4c   :  { %v1276_v34 = vpop.eup %1275 }
 0xb4d   :  { %v561_v38 = vmul.f32 %v1276_v34, %v559_v37 }
 0xbad   :  { %v564_v35 = vpop.permute.xlu0 %563 }
 0xbae   :  { %v566_v36 = vmul.f32 %v1276_v34, %v564_v35 }
 0xbb0   :  { %568 = vrot.lane.b32.xlu1 %v566_v36, %s1337_s15 }
 0xc22   :  { %v569_v39 = vpop.permute.xlu1 %568 }
 0xc23   :  { %v571_v40 = vadd.f32 %v569_v39, %v561_v38 }
 0xc25   :  { %1277 = vtanh.f32 %v571_v40  ;;  %v666_v55 = vrot.slane %v571_v40, 6 }
 0xc32   :  { %v1278_v41 = vpop.eup %1277 }
 0xc33   :  { %574 = vrot.lane.b32.xlu0 %v1278_v41, %s1337_s15 }
 0xca5   :  { %v575_v42 = vpop.permute.xlu0 %574 }
 0xca6   :  { %v577_v43 = vmul.f32 %v1276_v34, %v575_v42 }
 0xca8   :  { %579 = vrot.lane.b32.xlu1 %v577_v43, %s1338_s16 }
 0xd1a   :  { %v580_v44 = vpop.permute.xlu1 %579 }
 0xd1b   :  { %1201 = vmatmul.mubr.msk.f32.vlgmr.msra.gmra.mxu1 %vm150_vm3, %v580_v44 }
 0xd1c   :  { %1211 = vmatpush3.msra.mxu1 %v1410_v14  ;;  %1214 = vmatprep.mubr.msk.f32.mxu1 %vm1335_vm2, %v1334_v15 }
 0xd1d   :  { %1212 = vmatprep.subr.mxu1 %v1334_v15 }
 0xd1e   :  { %1213 = vmatpush3.msra.mxu1 %v1416_v16 }
 0xd1f   :  { %1224 = vmatprep.subr.mxu1 %v1334_v15 }
 0xddb   :  { %v649_v45 = vpop.f32.mrf.mxu1 }
 0xddc   :  { %v654_v46 = vrot.slane %v649_v45, 6 }
 0xddd   :  { %v1202_v47 = vpop.f32.mrf.mxu1 }
 0xdde   :  { %v656_v48 = vadd.f32 %v1395_v3, %v654_v46 }
 0xde0   :  { %v657_v49 = vadd.f32 %v1400_v4, %v656_v48 }
 0xde2   :  { %1279 = vtanh.f32 %v657_v49  ;;  %v1123_v14 = vmul.f32 -1.442695, %v657_v49 }
 0xde4   :  { %1281 = vpow2.f32 %v1123_v14  ;;  %v932_v14 = vld [vmem:[%s1552_s6 + $0x8] sm:$0xff] }
 0xdef   :  { %v1280_v50 = vpop.eup %1279 }
 0xdf0   :  { %670 = vrot.lane.b32.xlu0 %v1280_v50, %s1333_s0 }
 0xdf1   :  { %v1282_v51 = vpop.eup %1281 }
 0xdf2   :  { %v661_v52 = vadd.f32 1.0, %v1282_v51  ;;  %v931_v51 = vld [vmem:[%s1552_s6] sm:$0xff] }
 0xdf4   :  { %1283 = vrcp.f32 %v661_v52  ;;  %v930_v52 = vld [vmem:[%s1551_s5 + $0x8] sm:$0xff] }
 0xe01   :  { %v1284_v53 = vpop.eup %1283 }
 0xe02   :  { %v668_v56 = vmul.f32 %v1284_v53, %v666_v55 }
 0xe62   :  { %v671_v16 = vpop.permute.xlu0 %670 }
 0xe63   :  { %v673_v54 = vmul.f32 %v1284_v53, %v671_v16 }
 0xe65   :  { %675 = vrot.lane.b32.xlu1 %v673_v54, %s1337_s15 }
 0xed7   :  { %v676_v57 = vpop.permute.xlu1 %675 }
 0xed8   :  { %v678_v58 = vadd.f32 %v676_v57, %v668_v56 }
 0xeda   :  { %1285 = vtanh.f32 %v678_v58  ;;  %v774_v18 = vrot.slane %v678_v58, 6 }
 0xee7   :  { %v1286_v59 = vpop.eup %1285 }
 0xee8   :  { %681 = vrot.lane.b32.xlu0 %v1286_v59, %s1337_s15 }
 0xf5a   :  { %v682_v60 = vpop.permute.xlu0 %681 }
 0xf5b   :  { %v684_v61 = vmul.f32 %v1284_v53, %v682_v60  ;;  %v929_v53 = vld [vmem:[%s1551_s5] sm:$0xff] }
 0xf5d   :  { %v686_v62 = vrot.slane %v684_v61, 2 }
 0xf5f   :  { %687 = vrot.lane.b32.xlu1 %v686_v62, %s1338_s16 }
 0xfd1   :  { %v688_v63 = vpop.permute.xlu1 %687 }
 0xfd2   :  { %1208 = vmatmul.mubr.msk.f32.vlgmr.msra.gmra.mxu0 %vm150_vm3, %v688_v63 }
 0xfd3   :  { %1221 = vmatprep.mubr.msk.f32.mxu0 %vm1335_vm2, %v1334_v15  ;;  %1218 = vmatpush3.msra.mxu0 %v932_v14 }
 0xfd4   :  { %1219 = vmatprep.subr.mxu0 %v1334_v15 }
 0xfd5   :  { %1220 = vmatpush3.msra.mxu0 %v931_v51 }
0x1092   :  { %v757_v0 = vpop.f32.mrf.mxu0 }
0x1093   :  { %v762_v1 = vrot.slane %v757_v0, 4  ;;  %v1132_v0 = vld [vmem:[%s1553_s7] ss:$0 sm:$0xff] }
0x1094   :  { %v1209_v2 = vpop.f32.mrf.mxu0 }
0x1095   :  { %v764_v6 = vadd.f32 %v1395_v3, %v762_v1 }
0x1097   :  { %v765_v7 = vadd.f32 %v1400_v4, %v764_v6 }
0x1099   :  { %1287 = vtanh.f32 %v765_v7  ;;  %v1125_v9 = vmul.f32 -1.442695, %v765_v7 }
0x109b   :  { %1289 = vpow2.f32 %v1125_v9 }
0x10a6   :  { %v1288_v8 = vpop.eup %1287 }
0x10a7   :  { %778 = vrot.lane.b32.xlu0 %v1288_v8, %s1333_s0 }
0x10a8   :  { %v1290_v10 = vpop.eup %1289 }
0x10a9   :  { %v769_v11 = vadd.f32 1.0, %v1290_v10 }
0x10ab   :  { %1291 = vrcp.f32 %v769_v11 }
0x10b8   :  { %v1292_v12 = vpop.eup %1291 }
0x10b9   :  { %v776_v19 = vmul.f32 %v1292_v12, %v774_v18 }
0x1119   :  { %v779_v13 = vpop.permute.xlu0 %778 }
0x111a   :  { %v781_v17 = vmul.f32 %v1292_v12, %v779_v13 }
0x111c   :  { %783 = vrot.lane.b32.xlu1 %v781_v17, %s1337_s15 }
0x118e   :  { %v784_v20 = vpop.permute.xlu1 %783 }
0x118f   :  { %v786_v5 = vadd.f32 %v784_v20, %v776_v19 }
0x1191   :  { %1293 = vtanh.f32 %v786_v5  ;;  %v882_v47 = vrot.slane %v786_v5, 6 }
0x119e   :  { %v1294_v21 = vpop.eup %1293 }
0x119f   :  { %789 = vrot.lane.b32.xlu0 %v1294_v21, %s1337_s15 }
0x11a3   :  { %907 = vrot.lane.b32.xlu0 %v1128_v22, %s1339_s19 }
0x1211   :  { %v790_v23 = vpop.permute.xlu0 %789 }
0x1212   :  { %v792_v24 = vmul.f32 %v1292_v12, %v790_v23 }
0x1214   :  { %v794_v25 = vrot.slane %v792_v24, 4 }
0x1215   :  { %v908_v31 = vpop.permute.xlu0 %907 }
0x1216   :  { %795 = vrot.lane.b32.xlu1 %v794_v25, %s1338_s16  ;;  %v910_v33 = vadd.f32 %v1395_v3, %v908_v31 }
0x1218   :  { %v1129_v37 = vmul.f32 -1.442695, %v910_v33 }
0x1288   :  { %v796_v26 = vpop.permute.xlu1 %795 }
0x1289   :  { %1215 = vmatmul.mubr.msk.f32.vlgmr.msra.gmra.mxu1 %vm150_vm3, %v796_v26 }
0x128a   :  { %1228 = vmatprep.mubr.msk.f32.mxu1 %vm1335_vm2, %v1334_v15  ;;  %1225 = vmatpush3.msra.mxu1 %v930_v52 }
0x128b   :  { %1226 = vmatprep.subr.mxu1 %v1334_v15 }
0x128c   :  { %1227 = vmatpush3.msra.mxu1 %v929_v53 }
0x1349   :  { %v865_v27 = vpop.f32.mrf.mxu1 }
0x134a   :  { %v870_v28 = vrot.slane %v865_v27, 2 }
0x134b   :  { %v1216_v29 = vpop.f32.mrf.mxu1 }
0x134c   :  { %v872_v30 = vadd.f32 %v1395_v3, %v870_v28 }
0x134e   :  { %v873_v32 = vadd.f32 %v1400_v4, %v872_v30 }
0x1350   :  { %1295 = vtanh.f32 %v873_v32  ;;  %v1127_v36 = vmul.f32 -1.442695, %v873_v32 }
0x1351   :  { %1297 = vtanh.f32 %v910_v33 }
0x1352   :  { %1299 = vpow2.f32 %v1127_v36 }
0x1353   :  { %1301 = vpow2.f32 %v1129_v37 }
0x135d   :  { %v1296_v34 = vpop.eup %1295 }
0x135e   :  { %886 = vrot.lane.b32.xlu1 %v1296_v34, %s1333_s0  ;;  %v1298_v35 = vpop.eup %1297 }
0x135f   :  { %v1300_v38 = vpop.eup %1299 }
0x1360   :  { %v877_v39 = vadd.f32 1.0, %v1300_v38  ;;  %v1302_v40 = vpop.eup %1301 }
0x1361   :  { %v914_v41 = vadd.f32 1.0, %v1302_v40 }
0x1362   :  { %919 = vrot.lane.b32.xlu1 %v1298_v35, %s1333_s0  ;;  %1303 = vrcp.f32 %v877_v39 }
0x1363   :  { %1305 = vrcp.f32 %v914_v41 }
0x136f   :  { %v1304_v4 = vpop.eup %1303 }
0x1370   :  { %v1306_v43 = vpop.eup %1305  ;;  %v884_v48 = vmul.f32 %v1304_v4, %v882_v47 }
0x13d0   :  { %v887_v3 = vpop.permute.xlu1 %886 }
0x13d1   :  { %v889_v42 = vmul.f32 %v1304_v4, %v887_v3 }
0x13d3   :  { %891 = vrot.lane.b32.xlu0 %v889_v42, %s1337_s15 }
0x13d4   :  { %v920_v44 = vpop.permute.xlu1 %919 }
0x13d5   :  { %v922_v45 = vmul.f32 %v1306_v43, %v920_v44 }
0x13d7   :  { %1307 = vtanh.f32 %v922_v45 }
0x13e4   :  { %v1308_v46 = vpop.eup %1307 }
0x13e5   :  { %925 = vrot.lane.b32.xlu1 %v1308_v46, %s1336_s2 }
0x1445   :  { %v892_v49 = vpop.permute.xlu0 %891 }
0x1446   :  { %v894_v50 = vadd.f32 %v892_v49, %v884_v48 }
0x1448   :  { %1309 = vtanh.f32 %v894_v50 }
0x1455   :  { %v1310_v16 = vpop.eup %1309 }
0x1456   :  { %897 = vrot.lane.b32.xlu0 %v1310_v16, %s1337_s15 }
0x1457   :  { %v926_v54 = vpop.permute.xlu1 %925 }
0x1458   :  { %v928_v55 = vmul.f32 %v1306_v43, %v926_v54 }
0x145a   :  { %v934_v56 = vrot.slane %v928_v55, 6 }
0x145c   :  { %935 = vrot.lane.b32.xlu0 %v934_v56, %s1336_s2 }
0x14c8   :  { %v898_v57 = vpop.permute.xlu0 %897 }
0x14c9   :  { %v900_v58 = vmul.f32 %v1304_v4, %v898_v57 }
0x14cb   :  { %v1010_v59 = vrot.slane %v900_v58, 6 }
0x14cd   :  { %1011 = vrot.lane.b32.xlu1 %v1010_v59, %s1338_s16 }
0x14ce   :  { %v936_v60 = vpop.permute.xlu0 %935 }
0x14cf   :  { %1222 = vmatmul.mubr.msk.f32.vlgmr.msra.gmra.mxu0 %vm150_vm3, %v936_v60 }
0x153f   :  { %v1012_v61 = vpop.permute.xlu1 %1011 }
0x1540   :  { %1229 = vmatmul.mubr.msk.f32.vlgmr.msra.gmra.mxu1 %vm150_vm3, %v1012_v61 }
0x158f   :  { %v1005_v15 = vpop.f32.mrf.mxu0 }
0x1591   :  { %v1223_v62 = vpop.f32.mrf.mxu0 }
0x1600   :  { %v1081_v63 = vpop.f32.mrf.mxu1 }
0x1601   :  { %v1082_v1 = vadd.f32 %v1081_v63, %v1005_v15 }
0x1602   :  { %v1230_v2 = vpop.f32.mrf.mxu1 }
0x1603   :  { %v1092_v6 = vadd.f32 %v1132_v0, %v1082_v1 }
0x1605   :  { %1094 = vst.msk [vmem:[#allocation2] sm:$0x3] %vm1093_vm4, %v1092_v6 }
0x1606   :  { %1322 = shalt.err (!%p1319_p4)
}
0x1607   :  { %1104 = dma.vmem_to_hbm [thread:$0]  %s1102_s28, 32, %s1554_s8, [#allocation3]  }
0x1608   :  { %1331 = dma.done.wait [#allocation3], 32  }
0x1609   :  { %1332 = vsyncadd [#allocation3], 4294967264 }
0x160a   :  { %1108 = vsyncpa [#allocation3], 1 }

</bundles_post_ra>
